<compile_context>
chip_gen: v7x
topology: tpu7x:2x2x1
jax: 0.10.0
libtpu: 0.0.40
codegen_flags: <defaults>
</compile_context>

<pallas_src>
import functools

import jax
import jax.numpy as jnp
from jax.experimental import pallas as pl
from jax.experimental.pallas import tpu as pltpu

_ROW_ALIGN = 16  # valid sublane multiple for both f32 and bf16 row tiles


def _ff_kernel(x_ref, w1_ref, b1_ref, w2_ref, b2_ref, o_ref, acc_ref):
    """One (row-tile i, d_ff-tile k) step of FF(x) = ReLU(x W1 + b1) W2 + b2."""
    k = pl.program_id(1)

    @pl.when(k == 0)
    def _():
        acc_ref[...] = jnp.zeros_like(acc_ref)

    # First matmul on the current d_ff slice (MXU, bf16 in / f32 out),
    # bias + ReLU in f32 (VPU).
    h = jnp.dot(x_ref[...], w1_ref[...], preferred_element_type=jnp.float32)
    h = jnp.maximum(h + b1_ref[...].astype(jnp.float32), 0.0)
    # Second matmul: partial contraction over this d_ff slice, f32 accumulate.
    acc_ref[...] += jnp.dot(h.astype(w2_ref.dtype), w2_ref[...],
                            preferred_element_type=jnp.float32)

    @pl.when(k == pl.num_programs(1) - 1)
    def _():
        o_ref[...] = (acc_ref[...]
                      + b2_ref[...].astype(jnp.float32)).astype(o_ref.dtype)


def _vmem_budget():
    """Generation-aware VMEM budget: ~80% of physical per-core VMEM."""
    try:
        cap = pltpu.get_tpu_info().vmem_capacity_bytes
    except Exception:
        cap = 64 << 20  # conservative fallback (v7x-sized)
    return int(cap * 0.8)


def _vmem_estimate(tm, tkff, d_model, in_bytes, out_bytes):
    """VMEM bytes for one pipelined step, each buffer counted once."""
    est = (2 * tm * d_model * in_bytes        # x tile (double-buffered)
           + 2 * d_model * tkff * in_bytes    # W1 tile
           + 2 * tkff * d_model * in_bytes    # W2 tile
           + 2 * tkff * 4                     # b1 tile (f32)
           + 2 * d_model * 4                  # b2
           + 2 * tm * d_model * out_bytes     # out tile
           + tm * d_model * 4                 # f32 accumulator scratch (1x)
           + tm * tkff * 4                    # h intermediate (f32)
           + tm * tkff * in_bytes)            # bf16 cast of h for 2nd matmul
    return int(est * 1.25)                    # ~25% headroom for Mosaic scratch


def _dff_tile(requested, dff):
    """Lane-aligned (multiple of 128) divisor of d_ff, or the full d_ff."""
    t = min(requested, dff)
    if t >= dff:
        return dff
    t = (t // 128) * 128
    while t > 0 and dff % t:
        t -= 128
    return t if t > 0 else dff


def _select_tiles(m, d_model, dff, in_bytes, out_bytes, budget, tm_req, tkff_req):
    """Pick (tm, tkff): weight-resident if W1/W2 fit VMEM, else stream d_ff."""
    m_pad = max(_ROW_ALIGN, -(-m // _ROW_ALIGN) * _ROW_ALIGN)
    cands = [t for t in (2048, 1024, 512, 256, 128, 64, 32, 16) if t < m_pad]
    cands = [m_pad] + cands  # largest first
    if tm_req is not None:
        cands = [min(max(_ROW_ALIGN, (tm_req // _ROW_ALIGN) * _ROW_ALIGN), m_pad)]

    if tkff_req is not None:
        tk = _dff_tile(tkff_req, dff)
        for tm in cands:
            if _vmem_estimate(tm, tk, d_model, in_bytes, out_bytes) <= budget:
                return tm, tk
        return cands[-1], tk

    # 1) Weight-resident fast path: tkff == Dff, W1/W2 fetched from HBM once.
    for tm in cands:
        if _vmem_estimate(tm, dff, d_model, in_bytes, out_bytes) <= budget:
            return tm, dff
    # 2) Streamed weights over d_ff; prefer a big tm to amortize re-streaming.
    for tm in cands:
        for tk_req in (2048, 1024, 512, 256, 128):
            tk = _dff_tile(tk_req, dff)
            if tk < dff and _vmem_estimate(tm, tk, d_model,
                                           in_bytes, out_bytes) <= budget:
                return tm, tk
    return _ROW_ALIGN, _dff_tile(128, dff)


def _megacore_rows(tm, m):
    """v7x has 2 TensorCores: ensure the 'parallel' row axis has >= 2 tiles."""
    if m > _ROW_ALIGN and -(-m // tm) < 2:
        half = -(-m // 2)
        tm = max(_ROW_ALIGN, -(-half // _ROW_ALIGN) * _ROW_ALIGN)
    return tm


@functools.partial(jax.jit,
                   static_argnames=("tm", "tkff", "vmem_limit", "out_dtype"))
def _ff_pallas(x2d, w1, b1, w2, b2, *, tm, tkff, vmem_limit, out_dtype):
    m, d_model = x2d.shape
    dff = w1.shape[1]
    grid = (pl.cdiv(m, tm), dff // tkff)
    return pl.pallas_call(
        _ff_kernel,
        out_shape=jax.ShapeDtypeStruct((m, d_model), out_dtype),
        grid_spec=pltpu.PrefetchScalarGridSpec(
            num_scalar_prefetch=0,
            grid=grid,
            in_specs=[
                pl.BlockSpec((tm, d_model), lambda i, k: (i, 0)),    # x rows
                pl.BlockSpec((d_model, tkff), lambda i, k: (0, k)),  # W1 slice
                pl.BlockSpec((1, tkff), lambda i, k: (0, k)),        # b1 slice
                pl.BlockSpec((tkff, d_model), lambda i, k: (k, 0)),  # W2 slice
                pl.BlockSpec((1, d_model), lambda i, k: (0, 0)),     # b2
                # If xprof shows weight DMA still exposed in the streamed path,
                # add pipeline_mode=pl.Buffered(3) to the W1/W2 specs only.
            ],
            out_specs=pl.BlockSpec((tm, d_model), lambda i, k: (i, 0)),
            scratch_shapes=[pltpu.VMEM((tm, d_model), jnp.float32)],
        ),
        compiler_params=pltpu.CompilerParams(
            dimension_semantics=("parallel", "arbitrary"),
            vmem_limit_bytes=vmem_limit),
    )(x2d, w1, b1, w2, b2)


def feed_forward(x, w1, b1, w2, b2, *, compute_dtype=jnp.bfloat16,
                 tm=None, tkff=None):
    """x: [batch, seq_len, d_model] -> [batch, seq_len, d_model]."""
    B, S, D = x.shape
    Dff = w1.shape[1]
    M = B * S
    out_dtype = x.dtype

    # Biases stay f32 (bias-add runs in f32); accept 1-D or (1, N).
    b1 = jnp.asarray(b1, jnp.float32).reshape(1, Dff)
    b2 = jnp.asarray(b2, jnp.float32).reshape(1, D)

    x2d = x.reshape(M, D)
    if compute_dtype is not None:
        x2d = x2d.astype(compute_dtype)
        # Weights should be pre-cast ONCE by the caller; cast only as fallback.
        if w1.dtype != compute_dtype:
            w1 = w1.astype(compute_dtype)
        if w2.dtype != compute_dtype:
            w2 = w2.astype(compute_dtype)

    in_bytes = jnp.dtype(x2d.dtype).itemsize
    out_bytes = jnp.dtype(out_dtype).itemsize
    budget = _vmem_budget()
    tm_, tkff_ = _select_tiles(M, D, Dff, in_bytes, out_bytes, budget, tm, tkff)
    tm_ = _megacore_rows(tm_, M)
    est = _vmem_estimate(tm_, tkff_, D, in_bytes, out_bytes)
    vmem_limit = int(min(max(est, 32 << 20), budget))

    out2d = _ff_pallas(x2d, w1, b1, w2, b2, tm=tm_, tkff=tkff_,
                       vmem_limit=vmem_limit, out_dtype=out_dtype)
    return out2d.reshape(B, S, D)


def init_params(key, d_model, d_ff, dtype=jnp.float32):
    """Deterministic init (uniform, like torch Linear default bounds)."""
    k1, k2, k3, k4 = jax.random.split(key, 4)
    bound1 = 1.0 / (d_model ** 0.5)
    bound2 = 1.0 / (d_ff ** 0.5)
    w1 = jax.random.uniform(k1, (d_model, d_ff), dtype, -bound1, bound1)
    b1 = jax.random.uniform(k2, (d_ff,), dtype, -bound1, bound1)
    w2 = jax.random.uniform(k3, (d_ff, d_model), dtype, -bound2, bound2)
    b2 = jax.random.uniform(k4, (d_model,), dtype, -bound2, bound2)
    return w1, b1, w2, b2


if __name__ == "__main__":
    key = jax.random.PRNGKey(0)
    kx, kp = jax.random.split(key)

    # Small but lane-dense shapes: d_model = 128 keeps output stores unmasked,
    # M = 32 rows lets the v7x megacore split see two row tiles.
    batch, seq_len, d_model, d_ff = 2, 16, 128, 256
    x = jax.random.normal(kx, (batch, seq_len, d_model), jnp.float32)
    w1, b1, w2, b2 = init_params(kp, d_model, d_ff)

    # Cast weights to bf16 ONCE (persistent storage), not per call.
    w1_bf = w1.astype(jnp.bfloat16)
    w2_bf = w2.astype(jnp.bfloat16)

    out = feed_forward(x, w1_bf, b1, w2_bf, b2)
    out = jax.block_until_ready(out)

    # Reference emulating the kernel's bf16 MXU inputs with f32 accumulation.
    xq = x.astype(jnp.bfloat16).astype(jnp.float32)
    w1q = w1_bf.astype(jnp.float32)
    w2q = w2_bf.astype(jnp.float32)
    h = jnp.maximum(xq @ w1q + b1, 0.0)
    hq = h.astype(jnp.bfloat16).astype(jnp.float32)
    ref = hq @ w2q + b2

    assert out.shape == x.shape and out.dtype == x.dtype
    err = float(jnp.max(jnp.abs(out - ref)))
    assert jnp.allclose(out, ref, atol=2e-3, rtol=2e-3), err

    print("KERNEL_OK")
</pallas_src>

<mosaic_0001>
module attributes {stable_mosaic.version = 11 : i64} {
  func.func @_ff_kernel(%arg0: i32, %arg1: i32, %arg2: memref<16x128xbf16, #tpu.memory_space<vmem>>, %arg3: memref<128x256xbf16, #tpu.memory_space<vmem>>, %arg4: memref<1x256xf32, #tpu.memory_space<vmem>>, %arg5: memref<256x128xbf16, #tpu.memory_space<vmem>>, %arg6: memref<1x128xf32, #tpu.memory_space<vmem>>, %arg7: memref<16x128xf32, #tpu.memory_space<vmem>>, %arg8: memref<16x128xf32, #tpu.memory_space<vmem>>) attributes {dimension_semantics = [#tpu.dimension_semantics<parallel>, #tpu.dimension_semantics<arbitrary>], iteration_bounds = array<i64: 2, 1>, scalar_prefetch = 0 : i64, scratch_operands = 1 : i64, tpu.core_type = #tpu.core_type<tc>, window_params = [{transform_indices = @transform_0, window_bounds = array<i64: 16, 128>}, {transform_indices = @transform_1, window_bounds = array<i64: 128, 256>}, {transform_indices = @transform_2, window_bounds = array<i64: 1, 256>}, {transform_indices = @transform_3, window_bounds = array<i64: 256, 128>}, {pipeline_mode = #tpu.pipeline_mode<synchronous>, transform_indices = @transform_4, window_bounds = array<i64: 1, 128>}, {transform_indices = @transform_5, window_bounds = array<i64: 16, 128>}]} {
    %c0_i32 = arith.constant 0 : i32
    %0 = arith.cmpi eq, %arg1, %c0_i32 : i32
    %1 = arith.extui %0 : i1 to i32
    %c0_i32_0 = arith.constant 0 : i32
    %2 = arith.cmpi ne, %1, %c0_i32_0 : i32
    scf.if %2 {
      %cst_16 = arith.constant 0.000000e+00 : f32
      %20 = vector.broadcast %cst_16 : f32 to vector<16x128xf32>
      %c0_17 = arith.constant 0 : index
      %c0_18 = arith.constant 0 : index
      %21 = vector.load %arg8[%c0_17, %c0_18] : memref<16x128xf32, #tpu.memory_space<vmem>>, vector<16x128xf32>
      tpu.vector_store %arg8[%c0_17, %c0_18], %20 {strides = array<i32>} : memref<16x128xf32, #tpu.memory_space<vmem>>, vector<16x128xf32>,
    } else {
    }
    %c0 = arith.constant 0 : index
    %c0_1 = arith.constant 0 : index
    %3 = vector.load %arg2[%c0, %c0_1] : memref<16x128xbf16, #tpu.memory_space<vmem>>, vector<16x128xbf16>
    %c0_2 = arith.constant 0 : index
    %c0_3 = arith.constant 0 : index
    %4 = vector.load %arg3[%c0_2, %c0_3] : memref<128x256xbf16, #tpu.memory_space<vmem>>, vector<128x256xbf16>
    %cst = arith.constant dense<0.000000e+00> : vector<16x256xf32>
    %5 = tpu.matmul %3, %4, %cst {dimension_numbers = #tpu.dot_dimension_numbers<[1], [0], [0], [1], [0, 0, 1, 1], [], []>} : vector<16x128xbf16>, vector<128x256xbf16>, vector<16x256xf32> -> vector<16x256xf32>
    %c0_4 = arith.constant 0 : index
    %c0_5 = arith.constant 0 : index
    %6 = vector.load %arg4[%c0_4, %c0_5] : memref<1x256xf32, #tpu.memory_space<vmem>>, vector<1x256xf32>
    %7 = vector.broadcast %6 : vector<1x256xf32> to vector<16x256xf32>
    %8 = arith.addf %5, %7 : vector<16x256xf32>
    %cst_6 = arith.constant 0.000000e+00 : f32
    %9 = vector.broadcast %cst_6 : f32 to vector<16x256xf32>
    %10 = arith.maximumf %8, %9 : vector<16x256xf32>
    %c0_7 = arith.constant 0 : index
    %c0_8 = arith.constant 0 : index
    %11 = vector.load %arg8[%c0_7, %c0_8] : memref<16x128xf32, #tpu.memory_space<vmem>>, vector<16x128xf32>
    %12 = arith.truncf %10 : vector<16x256xf32> to vector<16x256xbf16>
    %c0_9 = arith.constant 0 : index
    %c0_10 = arith.constant 0 : index
    %13 = vector.load %arg5[%c0_9, %c0_10] : memref<256x128xbf16, #tpu.memory_space<vmem>>, vector<256x128xbf16>
    %cst_11 = arith.constant dense<0.000000e+00> : vector<16x128xf32>
    %14 = tpu.matmul %12, %13, %cst_11 {dimension_numbers = #tpu.dot_dimension_numbers<[1], [0], [0], [1], [0, 0, 1, 1], [], []>} : vector<16x256xbf16>, vector<256x128xbf16>, vector<16x128xf32> -> vector<16x128xf32>
    %15 = arith.addf %11, %14 : vector<16x128xf32>
    %c0_12 = arith.constant 0 : index
    %c0_13 = arith.constant 0 : index
    %16 = vector.load %arg8[%c0_12, %c0_13] : memref<16x128xf32, #tpu.memory_space<vmem>>, vector<16x128xf32>
    tpu.vector_store %arg8[%c0_12, %c0_13], %15 {strides = array<i32>} : memref<16x128xf32, #tpu.memory_space<vmem>>, vector<16x128xf32>,
    %c0_i32_14 = arith.constant 0 : i32
    %17 = arith.cmpi eq, %arg1, %c0_i32_14 : i32
    %18 = arith.extui %17 : i1 to i32
    %c0_i32_15 = arith.constant 0 : i32
    %19 = arith.cmpi ne, %18, %c0_i32_15 : i32
    scf.if %19 {
      %c0_16 = arith.constant 0 : index
      %c0_17 = arith.constant 0 : index
      %20 = vector.load %arg8[%c0_16, %c0_17] : memref<16x128xf32, #tpu.memory_space<vmem>>, vector<16x128xf32>
      %c0_18 = arith.constant 0 : index
      %c0_19 = arith.constant 0 : index
      %21 = vector.load %arg6[%c0_18, %c0_19] : memref<1x128xf32, #tpu.memory_space<vmem>>, vector<1x128xf32>
      %22 = vector.broadcast %21 : vector<1x128xf32> to vector<16x128xf32>
      %23 = arith.addf %20, %22 : vector<16x128xf32>
      %c0_20 = arith.constant 0 : index
      %c0_21 = arith.constant 0 : index
      %24 = vector.load %arg7[%c0_20, %c0_21] : memref<16x128xf32, #tpu.memory_space<vmem>>, vector<16x128xf32>
      tpu.vector_store %arg7[%c0_20, %c0_21], %23 {strides = array<i32>} : memref<16x128xf32, #tpu.memory_space<vmem>>, vector<16x128xf32>,
    } else {
    }
    return
  }
  func.func @transform_0(%arg0: i32, %arg1: i32) -> (i32, i32) {
    %c0_i32 = arith.constant 0 : i32
    %c0_i32_0 = arith.constant 0 : i32
    return %arg0, %c0_i32 : i32, i32
  }
  func.func @transform_1(%arg0: i32, %arg1: i32) -> (i32, i32) {
    %c0_i32 = arith.constant 0 : i32
    %c0_i32_0 = arith.constant 0 : i32
    return %c0_i32, %arg1 : i32, i32
  }
  func.func @transform_2(%arg0: i32, %arg1: i32) -> (i32, i32) {
    %c0_i32 = arith.constant 0 : i32
    %c0_i32_0 = arith.constant 0 : i32
    return %c0_i32, %arg1 : i32, i32
  }
  func.func @transform_3(%arg0: i32, %arg1: i32) -> (i32, i32) {
    %c0_i32 = arith.constant 0 : i32
    %c0_i32_0 = arith.constant 0 : i32
    return %arg1, %c0_i32 : i32, i32
  }
  func.func @transform_4(%arg0: i32, %arg1: i32) -> (i32, i32) {
    %c0_i32 = arith.constant 0 : i32
    %c0_i32_0 = arith.constant 0 : i32
    %c0_i32_1 = arith.constant 0 : i32
    return %c0_i32, %c0_i32_0 : i32, i32
  }
  func.func @transform_5(%arg0: i32, %arg1: i32) -> (i32, i32) {
    %c0_i32 = arith.constant 0 : i32
    %c0_i32_0 = arith.constant 0 : i32
    return %arg0, %c0_i32 : i32, i32
  }
}

</mosaic_0001>

<bundles_post_ra>
// kernel: _ff_pallas.1
= control target key start
LH: loop header
LB: loop body
LE: loop exit
PB: predicated region body
PF: predicated region fallthrough
CT: control target
= control target key end

     0   :  { %10 = vsyncpa [#allocation4], 0  ;;  %s1511_s0 = inlined_call_operand.hbm [shape: bf16[32,128], index: 0, kind: input, shape index: {}]   ;;  %s1512_s1 = inlined_call_operand.hbm [shape: bf16[128,256], index: 1, kind: input, shape index: {}]   ;;  %s1513_s2 = inlined_call_operand.vmem [shape: f32[1,256], index: 2, kind: input, shape index: {}]   ;;  %s1514_s3 = inlined_call_operand.hbm [shape: bf16[256,128], index: 3, kind: input, shape index: {}]   ;;  %s1515_s4 = inlined_call_operand.vmem [shape: f32[1,128], index: 4, kind: input, shape index: {}]   ;;  %s1516_s5 = inlined_call_operand.hbm [shape: f32[32,128], index: 5, kind: output, shape index: {}]  }
   0x1   :  { %12 = vsyncpa [#allocation4 + $0x1], 0 }
   0x2   :  { %13 = vsyncpa [#allocation7], 0 }
   0x3   :  { %14 = vsyncpa [#allocation5], 0 }
   0x4   :  { %16 = vsyncpa [#allocation5 + $0x1], 0  ;;  %s1240_s18 = smov 0   ;;  %s1242_s19 = smov 0  }
   0x5   :  { %s1244_s20 = smov 0   ;;  %s1246_s21 = smov 0  }
   0x6   :  { %s1248_s22 = smov 0   ;;  %s1250_s23 = smov 0  }
   0x7 LB: > { %s816_s24 = sadd.s32 4294967295, %s1197_s23   ;;  %s817_s25 = sadd.s32 4294967294, %s1197_s23   ;;  %s1197_s23 = sphi %s1250_s23, %s22_s23   ;;  %s1193_s22 = sphi %s1248_s22, %s1540_s22   ;;  %s1189_s21 = sphi %s1246_s21, %s1539_s21   ;;  %s1185_s20 = sphi %s1244_s20, %s1538_s20   ;;  %s1181_s19 = sphi %s1242_s19, %s1537_s19   ;;  %s1177_s18 = sphi %s1240_s18, %s1536_s18  }
   0x8   : > { %p54_p0 = scmp.ne.s32.totalorder %s1181_s19, %s1177_s18  ;;  %p1274_p1 = scmp.eq.s32.totalorder %s816_s24, 0 }
   0x9   : > { %p1278_p2 = scmp.eq.s32.totalorder %s816_s24, 1  ;;  %p183_p3 = scmp.eq.s32.totalorder %s817_s25, 1 }
   0xa   : > { %s1522_s26 = scalar_select %p1274_p1, 1, 0 }
   0xb   : > { %p1284_p4 = por %p1274_p1, %p54_p0  ;;  %p818_p5 = scmp.ge.s32.totalorder %s1197_s23, 1 }
   0xc   : > { %p1289_p6 = por %p183_p3, %p54_p0  ;;  %p190_p7 = scmp.lt.s32.totalorder %s1197_s23, 3 }
   0xd   : > { %s1524_s28 = scalar_select %p1284_p4, 1, 0 }
   0xe   : > { %s1525_s29 = scalar_select %p1289_p6, 1, 0 }
   0xf   : > { %p1294_p8 = pnand %p818_p5, %p190_p7  ;;  %s1199_s6 = smov [#allocation6]  }
  0x10   : > { %s205_s7 = sshll.u32 %s1199_s6, 4  ;;  %s1200_s9 = smov [#allocation8]   ;;  %s1298_s7 = int_to_ptr.vmem [resolvable:$true] %s205_s7 }
  0x11   : > { %p906_p9 = pneg %p1294_p8  ;;  %s229_s10 = sshll.u32 %s1200_s9, 4  ;;  %s1309_s10 = int_to_ptr.vmem [resolvable:$true] %s229_s10 }
  0x12   : > { %s1025_s13 = scalar_lea.hbm %s1512_s1, 2048 }
  0x13   : > { %p1305_p11 = pnand %p906_p9, %p1274_p1  ;;  %p1026_p12 = scmp.ne.s32.totalorder %s1512_s1, %s1025_s13 }
  0x14   : > { %p1032_p5 = scmp.lt.u32.totalorder %s1025_s13, %s1512_s1 }
  0x15   : > { %p1027_p13 = pneg %p1305_p11 }
  0x17   : > { %p1028_p0 = pnand %p1027_p13, %p1026_p12 }
  0x19   : > { %p1029_p3 = pneg %p1028_p0 }
  0x1b   : > { %p1034_p7 = pnand %p1032_p5, %p1029_p3 }
  0x1d   : > { %1037 = shalt.err (!%p1034_p7)
}
  0x1e   : > { %s1038_s24 = scalar_lea.vmem %s1298_s7, 2048  ;;  %p1046_p1 = scmp.lt.s32.totalorder %s1298_s7, %s1298_s7 }
  0x1f   : > { %p1039_p9 = scmp.ne.s32.totalorder %s1298_s7, %s1038_s24  ;;  %p1047_p12 = scmp.lt.s32.totalorder %s1038_s24, %s1038_s24 }
  0x21   : > { %p1041_p10 = pnand %p1039_p9, %p1027_p13  ;;  %p1048_p0 = por %p1047_p12, %p1046_p1 }
  0x23   : > { %p1042_p6 = pneg %p1041_p10 }
  0x25   : > { %p1049_p4 = pnand %p1048_p0, %p1042_p6 }
  0x27   : > { %1052 = shalt.err (!%p1049_p4)
}
  0x28   : > { %s1201_s25 = smov 128   ;;  %s1202_s6 = smov 8  }
  0x29   : > { %909 = dma.hbm_to_vmem [thread:$0]  (!%p1305_p11), %s1512_s1, 2048, %s1298_s7, [#allocation7], %s1201_s25, %s1201_s25, %s1202_s6  }
  0x2a   : > { %s1053_s14 = scalar_lea.hbm %s1514_s3, 2048 }
  0x2b   : > { %p1054_p1 = scmp.ne.s32.totalorder %s1514_s3, %s1053_s14  ;;  %p1060_p10 = scmp.lt.u32.totalorder %s1053_s14, %s1514_s3 }
  0x2d   : > { %p1056_p4 = pnand %p1054_p1, %p1027_p13 }
  0x2f   : > { %p1057_p6 = pneg %p1056_p4 }
  0x31   : > { %p1062_p3 = pnand %p1060_p10, %p1057_p6 }
  0x33   : > { %1065 = shalt.err (!%p1062_p3)
}
  0x34   : > { %s1066_s7 = scalar_lea.vmem %s1309_s10, 2048  ;;  %p1074_p12 = scmp.lt.s32.totalorder %s1309_s10, %s1309_s10 }
  0x35   : > { %p1067_p5 = scmp.ne.s32.totalorder %s1309_s10, %s1066_s7  ;;  %p1075_p0 = scmp.lt.s32.totalorder %s1066_s7, %s1066_s7 }
  0x37   : > { %p1069_p7 = pnand %p1067_p5, %p1027_p13  ;;  %p1076_p1 = por %p1075_p0, %p1074_p12 }
  0x39   : > { %p1070_p9 = pneg %p1069_p7 }
  0x3b   : > { %p1077_p4 = pnand %p1076_p1, %p1070_p9 }
  0x3d   : > { %1080 = shalt.err (!%p1077_p4)
}
  0x3e   : > { %s1520_s25 = smov 64   ;;  %s1204_s6 = smov 4  }
  0x3f   : > { %912 = dma.hbm_to_vmem [thread:$0]  (!%p1305_p11), %s1514_s3, 2048, %s1309_s10, [#allocation7], %s1520_s25, %s1520_s25, %s1204_s6  }
  0x40   : > { %s34_s12 = sadd.s32 1, %s1193_s22  ;;  %s41_s13 = sadd.s32 1, %s1185_s20 }
  0x41   : > { %p36_p13 = scmp.ge.s32.totalorder %s34_s12, 2  ;;  %p48_p6 = scmp.ne.s32.totalorder %s1185_s20, %s1181_s19 }
  0x42   : > { %p49_p10 = scmp.eq.s32.totalorder %s1197_s23, 0  ;;  %p923_p3 = scmp.lt.s32.totalorder %s1197_s23, 2 }
  0x43   : > { %s1542_s12 = smov (%p36_p13, %s34_s12), 0  ;;  %p1376_p7 = por %p1278_p2, %p48_p6 }
  0x44   : > { %p50_p5 = por %p49_p10, %p48_p6  ;;  %s38_s14 = ssub.s32 %s1193_s22, %s1542_s12 }
  0x45   : > { %s1528_s8 = scalar_select %p1376_p7, 1, 0 }
  0x46   : > { %s246_s15 = sand.u32 1, %s1185_s20   ;;  %p39_p9 = scmp.eq.s32.totalorder %s38_s14, 0 }
  0x47   : > { %s823_s10 = sshll.u32 %s246_s15, 3  ;;  %s870_s16 = sshll.u32 %s1193_s22, 7 }
  0x48   : > { %s1385_s17 = scalar_select %p39_p9, %s1185_s20, %s41_s13  }
  0x49   : > { %s1390_s9 = scalar_lea.hbm %s1511_s0, %s870_s16  ;;  %s250_s27 = scalar_lea.vmem [#allocation3], %s823_s10 }
  0x4a   : > { %s257_s11 = sshll.u32 %s250_s27, 4  ;;  %p1394_p2 = pnand %p923_p3, %p50_p5  ;;  %s1398_s11 = int_to_ptr.vmem [resolvable:$true] %s257_s11 }
  0x4b   : > { %s1400_s13 = scalar_lea.sflag [#allocation4], %s246_s15  ;;  %s1081_s14 = scalar_lea.hbm %s1390_s9, 128 }
  0x4c   : > { %p1082_p11 = scmp.ne.s32.totalorder %s1390_s9, %s1081_s14  ;;  %p1083_p12 = pneg %p1394_p2 }
  0x4d   : > { %s1086_s24 = scalar_lea.hbm %s1511_s0, 256  ;;  %p1087_p4 = scmp.lt.u32.totalorder %s1390_s9, %s1511_s0 }
  0x4e   : > { %p1084_p0 = pnand %p1083_p12, %p1082_p11  ;;  %p1088_p13 = scmp.lt.u32.totalorder %s1086_s24, %s1081_s14 }
  0x4f   : > { %p1090_p10 = scmp.lt.u32.totalorder %s1081_s14, %s1390_s9 }
  0x50   : > { %p1085_p1 = pneg %p1084_p0  ;;  %p1089_p6 = por %p1088_p13, %p1087_p4 }
  0x52   : > { %p1091_p3 = por %p1090_p10, %p1089_p6 }
  0x54   : > { %p1092_p5 = pnand %p1091_p3, %p1085_p1 }
  0x56   : > { %1095 = shalt.err (!%p1092_p5)
}
  0x57   : > { %s1096_s15 = scalar_lea.vmem %s1398_s11, 128  ;;  %s1205_s10 = smov [#allocation3]  }
  0x58   : > { %p1097_p9 = scmp.ne.s32.totalorder %s1398_s11, %s1096_s15  ;;  %s1101_s16 = sshll.u32 %s1205_s10, 4  ;;  %s1102_s16 = int_to_ptr.vmem [resolvable:$false] %s1101_s16 }
  0x59   : > { %s1103_s7 = scalar_lea.vmem %s1102_s16, 256  ;;  %p1104_p7 = scmp.lt.s32.totalorder %s1398_s11, %s1102_s16 }
  0x5a   : > { %p1099_p11 = pnand %p1097_p9, %p1083_p12  ;;  %p1105_p4 = scmp.lt.s32.totalorder %s1103_s7, %s1096_s15 }
  0x5c   : > { %p1100_p0 = pneg %p1099_p11  ;;  %p1106_p13 = por %p1105_p4, %p1104_p7 }
  0x5e   : > { %p1107_p6 = pnand %p1106_p13, %p1100_p0 }
  0x60   : > { %1110 = shalt.err (!%p1107_p6)
}
  0x61   : > { %s1530_s14 = smov 64   ;;  %269 = sbr.rel (%p1294_p8) target bundleno = 597 (0x255), region = 40 }
  0x62   : > { %916 = dma.hbm_to_vmem [thread:$0]  (!%p1394_p2), %s1390_s9, 128, %s1398_s11, %s1400_s13, %s1530_s14, %s1530_s14, %s1204_s6  }
  0x63   : > { %s1434_s24 = sand.u32 (!%p1294_p8), 1, %s1181_s19   ;;  %p1531_p7 = scmp.ne.s32.totalorder (!%p1294_p8), %s1524_s28, 0 }
  0x64   : > { %s827_s27 = sshll.u32 (!%p1294_p8), %s1434_s24, 3  ;;  %s272_s15 = scalar_lea.sflag (!%p1294_p8), [#allocation4], %s1434_s24 }
  0x65   : > { %s1438_s10 = scalar_lea.vmem (!%p1294_p8), [#allocation3], %s827_s27 }
  0x68   : > { %1164 = dma.done.wait (%p1531_p7), %s272_s15, 128  }
  0x69   : > { %1166 = vsyncadd (%p1531_p7), %s272_s15, 4294967168  ;;  %p1532_p2 = scmp.ne.s32.totalorder %s1522_s26, 0 }
  0x6b   : > { %1168 = dma.done.wait (%p1532_p2), [#allocation7], 4096  }
  0x6c   : > { %1170 = vsyncadd (%p1532_p2), [#allocation7], 4294963200  ;;  %v1206_v0 = vmov 0   ;;  %v984_v1 = vld [vmem:[#allocation6 + $0x4] ss:$8 sps:$4 sm:$0xff]   ;;  %v1013_v16 = vld [vmem:[#allocation8 + $0x50] sm:$0xff]   ;;  %v350_v34 = vlaneseq }
  0x6d   : > { %478 = vmatprep.mubr.bf16.mxu0 %v1206_v0  ;;  %v986_v2 = vld [vmem:[#allocation6] ss:$8 sps:$4 sm:$0xff]   ;;  %446 = vmatprep.subr.bf16.mxu0 %v984_v1  ;;  %v987_v3 = vld [vmem:[#allocation6 + $0x14] ss:$8 sps:$4 sm:$0xff]   ;;  %v989_v4 = vld [vmem:[#allocation6 + $0x10] ss:$8 sps:$4 sm:$0xff]  }
  0x6e   : > { %447 = vmatpush1.bf16.msra.mxu0 %v986_v2  ;;  %v990_v5 = vld [vmem:[#allocation6 + $0x24] ss:$8 sps:$4 sm:$0xff]   ;;  %v992_v6 = vld [vmem:[#allocation6 + $0x20] ss:$8 sps:$4 sm:$0xff]   ;;  %v993_v7 = vld [vmem:[#allocation6 + $0x34] ss:$8 sps:$4 sm:$0xff]  }
  0x6f   : > { %448 = vmatprep.subr.bf16.mxu0 %v987_v3  ;;  %v995_v8 = vld [vmem:[#allocation6 + $0x30] ss:$8 sps:$4 sm:$0xff]   ;;  %v996_v9 = vld [vmem:[#allocation6 + $0x44] ss:$8 sps:$4 sm:$0xff]   ;;  %v998_v11 = vld [vmem:[#allocation6 + $0x40] ss:$8 sps:$4 sm:$0xff]  }
  0x70   : > { %v1009_v10 = vld [vmem:[#allocation8 + $0x40] sm:$0xff]   ;;  %v999_v13 = vld [vmem:[#allocation6 + $0x54] ss:$8 sps:$4 sm:$0xff]   ;;  %v1011_v14 = vld [vmem:[#allocation8 + $0x48] sm:$0xff]   ;;  %v351_v35 = vshrl.u32 %v350_v34, 7  ;;  %s830_s30 = sshll.u32 %s1434_s24, 4 }
  0x71   : > { %v1010_v12 = vld [vmem:[#allocation8] sm:$0xff]   ;;  %872 = vmatprep.subr.bf16.mxu1 %v1009_v10  ;;  %v1012_v15 = vld [vmem:[#allocation8 + $0x8] sm:$0xff]   ;;  %v1001_v17 = vld [vmem:[#allocation6 + $0x50] ss:$8 sps:$4 sm:$0xff]   ;;  %s313_s9 = scalar_lea.vmem [#allocation9], %s830_s30  ;;  %s871_s13 = sshll.u32 %s1189_s21, 8 }
  0x72   : > { %449 = vmatpush1.bf16.msra.mxu0 %v989_v4  ;;  %873 = vmatpush3.bf16.msra.mxu1 %v1010_v12  ;;  %v1002_v18 = vld [vmem:[#allocation6 + $0x64] ss:$8 sps:$4 sm:$0xff]   ;;  %v1014_v19 = vld [vmem:[#allocation8 + $0x10] sm:$0xff]   ;;  %v1015_v20 = vld [vmem:[#allocation8 + $0x58] sm:$0xff]   ;;  %v352_v36 = vsub.s32 0, %v351_v35  ;;  %v356_v38 = vsub.s32 1, %v351_v35  ;;  %s1462_s14 = scalar_lea.hbm %s1516_s5, %s871_s13 }
  0x73   : > { %450 = vmatprep.subr.bf16.mxu0 %v990_v5  ;;  %874 = vmatprep.subr.bf16.mxu1 %v1011_v14  ;;  %v1004_v21 = vld [vmem:[#allocation6 + $0x60] ss:$8 sps:$4 sm:$0xff]   ;;  %v1005_v22 = vld [vmem:[#allocation6 + $0x74] ss:$8 sps:$4 sm:$0xff]   ;;  %v1007_v25 = vld [vmem:[#allocation6 + $0x70] ss:$8 sps:$4 sm:$0xff]  }
  0x74   : > { %v1016_v23 = vld [vmem:[#allocation8 + $0x18] sm:$0xff]   ;;  %v1017_v24 = vld [vmem:[#allocation8 + $0x60] sm:$0xff]   ;;  %v1019_v27 = vld [vmem:[#allocation8 + $0x68] sm:$0xff]   ;;  %s700_s11 = sshll.u32 %s313_s9, 4  ;;  %s687_s27 = scalar_lea.sflag [#allocation5], %s1434_s24  ;;  %s1457_s11 = int_to_ptr.vmem [resolvable:$true] %s700_s11 }
  0x75   : > { %v1018_v26 = vld [vmem:[#allocation8 + $0x20] sm:$0xff]   ;;  %v1008_v28 = vld [vmem:[%s1438_s10] sm:$0xff]   ;;  %v1020_v29 = vld [vmem:[#allocation8 + $0x28] sm:$0xff]   ;;  %s1111_s15 = scalar_lea.vmem %s1457_s11, 256  ;;  %p1533_p12 = scmp.ne.s32.totalorder %s1528_s8, 0 }
  0x76   : > { %451 = vmatpush1.bf16.msra.mxu0 %v992_v6  ;;  %875 = vmatpush3.bf16.msra.mxu1 %v1012_v15  ;;  %v1021_v30 = vld [vmem:[#allocation8 + $0x70] sm:$0xff]   ;;  %v1023_v32 = vld [vmem:[#allocation8 + $0x78] sm:$0xff]   ;;  %p1112_p8 = scmp.ne.s32.totalorder %s1457_s11, %s1111_s15  ;;  %s1207_s21 = smov [#allocation9]  }
  0x77   : > { %452 = vmatprep.subr.bf16.mxu0 %v993_v7  ;;  %876 = vmatprep.subr.bf16.mxu1 %v1013_v16  ;;  %v1022_v31 = vld [vmem:[#allocation8 + $0x30] sm:$0xff]   ;;  %v1024_v33 = vld [vmem:[#allocation8 + $0x38] sm:$0xff]   ;;  %s1115_s10 = sshll.u32 %s1207_s21, 4  ;;  %s1116_s10 = int_to_ptr.vmem [resolvable:$false] %s1115_s10 }
  0x78   : > { %v348_v37 = vld [vmem:[%s1513_s2] sm:$0x3]  ;;  %p1113_p1 = pnand %p1112_p8, %p1533_p12  ;;  %s1117_s26 = scalar_lea.vmem %s1116_s10, 512 }
  0x79   : > { %v353_v39 = vrot.slane %v348_v37, %v352_v36  ;;  %v357_v40 = vrot.slane %v348_v37, %v356_v38  ;;  %v864_v57 = vld [vmem:[%s1515_s4] ss:$0 sm:$0xff]  ;;  %p1118_p3 = scmp.lt.s32.totalorder %s1457_s11, %s1116_s10  ;;  %p1119_p5 = scmp.lt.s32.totalorder %s1117_s26, %s1111_s15 }
  0x7a   : > { %453 = vmatpush1.bf16.msra.mxu0 %v995_v8  ;;  %877 = vmatpush3.bf16.msra.mxu1 %v1014_v19  ;;  %p1114_p10 = pneg %p1113_p1 }
  0x7b   : > { %454 = vmatprep.subr.bf16.mxu0 %v996_v9  ;;  %878 = vmatprep.subr.bf16.mxu1 %v1015_v20  ;;  %p1120_p9 = por %p1119_p5, %p1118_p3 }
  0x7d   : > { %p1121_p11 = pnand %p1120_p9, %p1114_p10 }
  0x7e   : > { %455 = vmatpush1.bf16.msra.mxu0 %v998_v11  ;;  %879 = vmatpush3.bf16.msra.mxu1 %v1016_v23 }
  0x7f   : > { %456 = vmatprep.subr.bf16.mxu0 %v999_v13  ;;  %880 = vmatprep.subr.bf16.mxu1 %v1017_v24 }
  0x82   : > { %457 = vmatpush1.bf16.msra.mxu0 %v1001_v17  ;;  %881 = vmatpush3.bf16.msra.mxu1 %v1018_v26 }
  0x83   : > { %458 = vmatprep.subr.bf16.mxu0 %v1002_v18  ;;  %882 = vmatprep.subr.bf16.mxu1 %v1019_v27 }
  0x86   : > { %459 = vmatpush1.bf16.msra.mxu0 %v1004_v21  ;;  %883 = vmatpush3.bf16.msra.mxu1 %v1020_v29 }
  0x87   : > { %460 = vmatprep.subr.bf16.mxu0 %v1005_v22  ;;  %884 = vmatprep.subr.bf16.mxu1 %v1021_v30 }
  0x8a   : > { %461 = vmatpush1.bf16.msra.mxu0 %v1007_v25  ;;  %885 = vmatpush3.bf16.msra.mxu1 %v1022_v31 }
  0x8b   : > { %886 = vmatprep.subr.bf16.mxu1 %v1023_v32 }
  0x8d   : > { %479 = vmatmul.mubr.bf16.vlgmr.msra.gmra.mrb[0].mxu0 %v1008_v28 }
  0x8e   : > { %887 = vmatpush3.bf16.msra.mxu1 %v1024_v33 }
 0x160   : > { %v480_v41 = vpop.f32.mrb[0].mxu0 }
 0x161   : > { %v481_v42 = vadd.f32 %v480_v41, %v353_v39  ;;  %v482_v43 = vpop.f32.mrb[1].mxu0 }
 0x162   : > { %v483_v44 = vadd.f32 %v482_v43, %v357_v40  ;;  %v484_v45 = vpop.f32.mrb[2].mxu0 }
 0x163   : > { %v485_v46 = vadd.f32 %v484_v45, %v353_v39  ;;  %v486_v47 = vpop.f32.mrb[3].mxu0  ;;  %v489_v49 = vmax.f32 %v481_v42, 0.0 }
 0x164   : > { %v487_v48 = vadd.f32 %v486_v47, %v357_v40  ;;  %v490_v51 = vmax.f32 %v483_v44, 0.0 }
 0x165   : > { %v491_v50 = vmax.f32 %v485_v46, 0.0 }
 0x166   : > { %v492_v52 = vmax.f32 %v487_v48, 0.0 }
 0x167   : > { %v495_v53 = vpack.c.bf16 %v491_v50, %v489_v49 }
 0x168   : > { %v496_v54 = vpack.c.bf16 %v492_v52, %v490_v51 }
 0x16a   : > { %657 = vmatprep.mubr.bf16.mxu1 %v496_v54 }
 0x16b   : > { %658 = vmatmul.mubr.bf16.vlgmr.msra.gmra.mrb[0].mxu1 %v495_v53 }
 0x23e   : > { %v888_v55 = vpop.f32.mrb[0].mxu1 }
 0x23f   : > { %v889_v56 = vpop.f32.mrb[1].mxu1 }
 0x240   : > { %v890_v58 = vadd.f32 %v889_v56, %v888_v55  ;;  %v891_v59 = vpop.f32.mrb[2].mxu1 }
 0x241   : > { %v892_v60 = vpop.f32.mrb[3].mxu1 }
 0x242   : > { %v682_v61 = vadd.f32 %v890_v58, %v864_v57  ;;  %v893_v62 = vadd.f32 %v892_v60, %v891_v59 }
 0x244   : > { %684 = vst [vmem:[%s313_s9] sm:$0xff] %v682_v61  ;;  %v683_v63 = vadd.f32 %v893_v62, %v864_v57 }
 0x246   : > { %685 = vst [vmem:[%s313_s9 + $0x8] sm:$0xff] %v683_v63 }
 0x247   : > { %1124 = shalt.err (!%p1121_p11)
}
 0x248   : > { %s1125_s28 = scalar_lea.hbm %s1462_s14, 256  ;;  %s1129_s6 = scalar_lea.hbm %s1516_s5, 512 }
 0x249   : > { %p1126_p0 = scmp.ne.s32.totalorder %s1462_s14, %s1125_s28  ;;  %p1130_p6 = scmp.lt.u32.totalorder %s1462_s14, %s1516_s5 }
 0x24a   : > { %p1131_p7 = scmp.lt.u32.totalorder %s1129_s6, %s1125_s28  ;;  %p1133_p8 = scmp.lt.u32.totalorder %s1125_s28, %s1462_s14 }
 0x24b   : > { %p1127_p4 = pnand %p1126_p0, %p1533_p12 }
 0x24c   : > { %p1132_p2 = por %p1131_p7, %p1130_p6 }
 0x24d   : > { %p1128_p13 = pneg %p1127_p4 }
 0x24e   : > { %p1134_p1 = por %p1133_p8, %p1132_p2 }
 0x250   : > { %p1135_p10 = pnand %p1134_p1, %p1128_p13 }
 0x252   : > { %1138 = shalt.err (!%p1135_p10)
}
 0x253   : > { %s1208_s16 = smov 128   ;;  %s1209_s7 = smov 8  }
 0x254   : > { %904 = dma.vmem_to_hbm [thread:$0]  (%p1533_p12), %s1457_s11, 256, %s1462_s14, %s687_s27, %s1208_s16, %s1208_s16, %s1209_s7  }
 0x255 PF: > { %s715_s15 = sand.u32 1, %s1177_s18   ;;  %p1534_p3 = scmp.ne.s32.totalorder %s1525_s29, 0 }
 0x256   : > { %p1535_p5 = scmp.ge.s32.totalorder %s1197_s23, 2  ;;  %s716_s21 = scalar_lea.sflag [#allocation5], %s715_s15 }
 0x258   : > { %p918_p9 = pnand %p1535_p5, %p1534_p3 }
 0x25a   : > { %1172 = dma.done.wait (!%p918_p9), %s716_s21, 256  }
 0x25b   : > { %1174 = vsyncadd (!%p918_p9), %s716_s21, 4294967040  ;;  %s22_s23 = sadd.s32 1, %s1197_s23   ;;  %s1536_s18 = smov %s1181_s19 }
 0x25c   : > { %p19_p11 = scmp.ge.s32.totalorder %s22_s23, 4   ;;  %s1537_s19 = smov %s1185_s20 }
 0x25d   : > { %s1538_s20 = smov %s1385_s17  ;;  %s1539_s21 = smov %s1193_s22 }
 0x25e   : > { %s1540_s22 = smov %s1542_s12  ;;  %21 = sbr.rel (!%p19_p11) target bundleno = 7 (0x7), region = 106 }
 0x265   :  { %721 = vsyncpa [#allocation4], 1 }
 0x266   :  { %723 = vsyncpa [#allocation4 + $0x1], 1 }
 0x267   :  { %724 = vsyncpa [#allocation7], 1 }
 0x268   :  { %725 = vsyncpa [#allocation5], 1 }
 0x269   :  { %727 = vsyncpa [#allocation5 + $0x1], 1 }

</bundles_post_ra>
